<compile_context>
chip_gen: v7x
topology: tpu7x:2x2x1
jax: 0.10.0
libtpu: 0.0.40
codegen_flags: <defaults>
</compile_context>

<pallas_src>
import functools

import jax
import jax.numpy as jnp
from jax.experimental import pallas as pl
from jax.experimental.pallas import tpu as pltpu

ALPHA = 0.1
EPS = 1e-8


def _round_up(x, m):
    return ((x + m - 1) // m) * m


def _vmem_budget_bytes():
    """Per-generation scoped-VMEM budget (v5e/v6e: 128 MiB phys, v7x: 64 MiB)."""
    cap = 128 * 1024 * 1024
    try:
        cap = int(getattr(pltpu.get_tpu_info(), "vmem_capacity_bytes", cap))
    except Exception:  # conservative fallback (covers v7x)
        cap = 64 * 1024 * 1024
    # Leave headroom for compiler-internal scratch; cap the scoped limit.
    return max(24 * 1024 * 1024, min(cap - 16 * 1024 * 1024, 100 * 1024 * 1024))


def _choose_tile_n(num_tasks, n, budget):
    """Lane-aligned tile: each (T, tile_n) f32 buffer targets ~8 MiB, so the
    double-buffered pair stays well under half the scoped budget."""
    per_buf = min(8 * 1024 * 1024, budget // 4)
    tile_n = (per_buf // (max(num_tasks, 1) * 4)) // 128 * 128
    tile_n = max(128, tile_n)
    return min(tile_n, _round_up(n, 128))


# ---------------------------------------------------------------------------
# Fast path: whole loss slab resident in VMEM, single fused kernel.
# ---------------------------------------------------------------------------
def _fused_kernel(x_ref, run_ref, out_ref, new_run_ref, *, n_true):
    x = x_ref[...]                                        # (T, N) f32
    if n_true > 1:
        # Exact two-pass variance (cheap: data is already VMEM-resident).
        mean = jnp.sum(x, axis=1, keepdims=True) * (1.0 / n_true)
        d = x - mean
        var = jnp.sum(d * d, axis=1, keepdims=True) * (1.0 / (n_true - 1))
        std = jnp.sqrt(var)
    else:
        std = jnp.ones((x.shape[0], 1), jnp.float32)
    new_run = (1.0 - ALPHA) * run_ref[...] + ALPHA * std
    new_run_ref[...] = new_run
    inv = 1.0 / (new_run + EPS)                           # exact; only T values
    out_ref[...] = jnp.sum(x * inv, axis=0, keepdims=True)


def _fused_path(losses, running_std, vmem_limit):
    T, N = losses.shape
    return pl.pallas_call(
        functools.partial(_fused_kernel, n_true=N),
        out_shape=(
            jax.ShapeDtypeStruct((1, N), jnp.float32),
            jax.ShapeDtypeStruct((T, 1), jnp.float32),
        ),
        compiler_params=pltpu.CompilerParams(vmem_limit_bytes=vmem_limit),
    )(losses, running_std)


# ---------------------------------------------------------------------------
# Large-N path: two tiled sweeps over `losses`.
# ---------------------------------------------------------------------------
def _stats_kernel(x_ref, psum_ref, psumsq_ref, *, n_true, tile_n,
                  tiles_per_split):
    """Phase 1: accumulate per-task sum / sumsq over this split's N tiles."""
    c = pl.program_id(0)   # split index ("parallel": shards across v7x's 2 TCs)
    j = pl.program_id(1)   # tile within split ("arbitrary" reduction axis)

    @pl.when(j == 0)
    def _():
        psum_ref[...] = jnp.zeros_like(psum_ref)
        psumsq_ref[...] = jnp.zeros_like(psumsq_ref)

    # Global tile index; columns past the true N (ragged tail, or overflow
    # tiles of an uneven split) are masked to zero -> no jnp.pad HBM copy.
    gt = c * tiles_per_split + j
    col = gt * tile_n + jax.lax.broadcasted_iota(jnp.int32, x_ref.shape, 1)
    x = jnp.where(col < n_true, x_ref[...], 0.0)          # (T, tile_n)

    # Mosaic lowers the lane reduction as per-vreg VPU accumulation plus one
    # cross-lane XLU collapse per tile; with ~8 MiB tiles that collapse (and
    # the f32 accumulation error) is negligible.
    psum_ref[...] += jnp.sum(x, axis=1, keepdims=True)[None]
    psumsq_ref[...] += jnp.sum(x * x, axis=1, keepdims=True)[None]


def _normalize_kernel(inv_ref, x_ref, out_ref):
    """Phase 2: fused per-task scale + task reduction as an MXU matvec."""
    # (1, T) @ (T, tile_n) -> (1, tile_n), lane-dense output.
    out_ref[...] = jnp.dot(inv_ref[...], x_ref[...],
                           preferred_element_type=jnp.float32)


def _tiled_path(losses, running_std, tile_n, vmem_limit):
    T, N = losses.shape
    grid_n = pl.cdiv(N, tile_n)
    n_splits = 2 if grid_n >= 2 else 1
    tiles_per_split = pl.cdiv(grid_n, n_splits)

    def x_map(c, j):
        # Clamp so overflow steps of the last split re-read a valid tile
        # (their contribution is masked to zero in-kernel).
        return (0, jnp.minimum(c * tiles_per_split + j, grid_n - 1))

    psum, psumsq = pl.pallas_call(
        functools.partial(_stats_kernel, n_true=N, tile_n=tile_n,
                          tiles_per_split=tiles_per_split),
        out_shape=(
            jax.ShapeDtypeStruct((n_splits, T, 1), jnp.float32),
            jax.ShapeDtypeStruct((n_splits, T, 1), jnp.float32),
        ),
        grid_spec=pltpu.PrefetchScalarGridSpec(
            num_scalar_prefetch=0,
            grid=(n_splits, tiles_per_split),
            in_specs=[pl.BlockSpec((T, tile_n), x_map)],
            out_specs=[
                pl.BlockSpec((1, T, 1), lambda c, j: (c, 0, 0)),
                pl.BlockSpec((1, T, 1), lambda c, j: (c, 0, 0)),
            ],
        ),
        compiler_params=pltpu.CompilerParams(
            dimension_semantics=("parallel", "arbitrary"),
            vmem_limit_bytes=vmem_limit,
        ),
    )(losses)

    # Finalize statistics on 2*T scalars in plain JAX (no extra kernel).
    s = jnp.sum(psum, axis=0)       # (T, 1)
    ss = jnp.sum(psumsq, axis=0)    # (T, 1)
    if N > 1:
        # TODO(synk): one-pass sum/sumsq can cancel when mean >> std at huge N;
        # switch to a per-split shifted-mean merge if that regime matters.
        var = (ss - s * s * (1.0 / N)) * (1.0 / (N - 1))
        std = jnp.sqrt(jnp.maximum(var, 0.0))
    else:
        std = jnp.ones_like(s)
    new_run = (1.0 - ALPHA) * running_std + ALPHA * std
    inv_row = (1.0 / (new_run + EPS)).T                   # (1, T)

    out = pl.pallas_call(
        _normalize_kernel,
        out_shape=jax.ShapeDtypeStruct((1, N), jnp.float32),
        grid_spec=pltpu.PrefetchScalarGridSpec(
            num_scalar_prefetch=0,
            grid=(grid_n,),
            in_specs=[
                pl.BlockSpec((1, T), lambda j: (0, 0)),
                pl.BlockSpec((T, tile_n), lambda j: (0, j)),
            ],
            out_specs=pl.BlockSpec((1, tile_n), lambda j: (0, j)),
        ),
        compiler_params=pltpu.CompilerParams(
            dimension_semantics=("parallel",),
            vmem_limit_bytes=vmem_limit,
        ),
    )(inv_row, losses)
    return out, new_run


# ---------------------------------------------------------------------------
# Dispatch
# ---------------------------------------------------------------------------
def normalized_loss(losses, running_std, *, tile_n=None):
    """losses: (T, N) f32; running_std: (T, 1) or (T,) f32
       -> (summed_loss (1, N), new_running_std (T, 1))."""
    losses = jnp.asarray(losses, jnp.float32)
    running_std = jnp.asarray(running_std, jnp.float32).reshape(-1, 1)
    T, N = losses.shape
    budget = _vmem_budget_bytes()

    if tile_n is None:
        # VMEM-resident fast path: one HBM read of `losses`, one launch.
        # Threshold is generation-aware (slack for pipeline buffering).
        resident_bytes = 2 * (T + 1) * N * 4
        if resident_bytes <= (budget * 3) // 4:
            return _fused_path(losses, running_std, budget)
        tile_n = _choose_tile_n(T, N, budget)
    else:
        tile_n = max(128, _round_up(int(tile_n), 128))
    return _tiled_path(losses, running_std, tile_n, budget)


def _reference(losses, running_std):
    """Pure-JAX reference mirroring the PyTorch forward."""
    _, N = losses.shape
    if N > 1:
        std = jnp.std(losses, axis=1, ddof=1, keepdims=True)
    else:
        std = jnp.ones_like(running_std)
    new_run = (1.0 - ALPHA) * running_std + ALPHA * std
    out = jnp.sum(losses / (new_run + EPS), axis=0, keepdims=True)
    return out, new_run


if __name__ == "__main__":
    num_tasks, n_elems = 8, 640   # N deliberately not a multiple of the tile

    key = jax.random.PRNGKey(0)
    k1, _ = jax.random.split(key)
    # per-task, per-sample losses (non-negative, like typical loss values)
    losses = jnp.abs(jax.random.normal(k1, (num_tasks, n_elems),
                                       dtype=jnp.float32))
    # module __init__: running_std = ones(num_tasks)
    running_std = jnp.ones((num_tasks, 1), jnp.float32)

    ref_out, ref_run = _reference(losses, running_std)

    # 1) Default dispatch -> VMEM-resident fused fast path.
    out, new_run = normalized_loss(losses, running_std)
    jax.block_until_ready((out, new_run))
    assert out.shape == (1, n_elems)
    assert new_run.shape == (num_tasks, 1)
    assert jnp.allclose(out, ref_out, rtol=1e-5, atol=1e-5)
    assert jnp.allclose(new_run, ref_run, rtol=1e-5, atol=1e-5)

    # 2) Forced tiled path (small tile) -> exercises the 2-way split stats
    #    pass, ragged-tail masking (640 % 256 != 0) and the MXU matvec phase.
    out_t, new_run_t = normalized_loss(losses, running_std, tile_n=256)
    jax.block_until_ready((out_t, new_run_t))
    assert jnp.allclose(out_t, ref_out, rtol=1e-5, atol=1e-5)
    assert jnp.allclose(new_run_t, ref_run, rtol=1e-5, atol=1e-5)

    print("KERNEL_OK")
</pallas_src>

<mosaic_0001>
module attributes {stable_mosaic.version = 11 : i64} {
  func.func @_fused_kernel(%arg0: memref<8x640xf32, #tpu.memory_space<vmem>>, %arg1: memref<8x1xf32, #tpu.memory_space<vmem>>, %arg2: memref<1x640xf32, #tpu.memory_space<vmem>>, %arg3: memref<8x1xf32, #tpu.memory_space<vmem>>) attributes {dimension_semantics = [], scalar_prefetch = 0 : i64, scratch_operands = 0 : i64, tpu.core_type = #tpu.core_type<tc>} {
    %c0 = arith.constant 0 : index
    %c0_0 = arith.constant 0 : index
    %0 = vector.load %arg0[%c0, %c0_0] : memref<8x640xf32, #tpu.memory_space<vmem>>, vector<8x640xf32>
    %cst = arith.constant dense<0.000000e+00> : vector<8xf32>
    %1 = vector.multi_reduction <add>, %0, %cst [1] : vector<8x640xf32> to vector<8xf32>
    %2 = vector.shape_cast %1 : vector<8xf32> to vector<8x1xf32>
    %cst_1 = arith.constant 1.562500e-03 : f32
    %3 = vector.broadcast %cst_1 : f32 to vector<8x1xf32>
    %4 = arith.mulf %2, %3 : vector<8x1xf32>
    %5 = vector.broadcast %4 : vector<8x1xf32> to vector<8x640xf32>
    %6 = arith.subf %0, %5 : vector<8x640xf32>
    %7 = arith.mulf %6, %6 : vector<8x640xf32>
    %cst_2 = arith.constant dense<0.000000e+00> : vector<8xf32>
    %8 = vector.multi_reduction <add>, %7, %cst_2 [1] : vector<8x640xf32> to vector<8xf32>
    %9 = vector.shape_cast %8 : vector<8xf32> to vector<8x1xf32>
    %cst_3 = arith.constant 0.00156494521 : f32
    %10 = vector.broadcast %cst_3 : f32 to vector<8x1xf32>
    %11 = arith.mulf %9, %10 : vector<8x1xf32>
    %12 = math.sqrt %11 : vector<8x1xf32>
    %c0_4 = arith.constant 0 : index
    %c0_5 = arith.constant 0 : index
    %13 = vector.load %arg1[%c0_4, %c0_5] : memref<8x1xf32, #tpu.memory_space<vmem>>, vector<8x1xf32>
    %cst_6 = arith.constant 0.899999976 : f32
    %14 = vector.broadcast %cst_6 : f32 to vector<8x1xf32>
    %15 = arith.mulf %14, %13 : vector<8x1xf32>
    %cst_7 = arith.constant 1.000000e-01 : f32
    %16 = vector.broadcast %cst_7 : f32 to vector<8x1xf32>
    %17 = arith.mulf %16, %12 : vector<8x1xf32>
    %18 = arith.addf %15, %17 : vector<8x1xf32>
    %c0_8 = arith.constant 0 : index
    %c0_9 = arith.constant 0 : index
    %19 = vector.load %arg3[%c0_8, %c0_9] : memref<8x1xf32, #tpu.memory_space<vmem>>, vector<8x1xf32>
    tpu.vector_store %arg3[%c0_8, %c0_9], %18 {strides = array<i32>} : memref<8x1xf32, #tpu.memory_space<vmem>>, vector<8x1xf32>,
    %cst_10 = arith.constant 9.99999993E-9 : f32
    %20 = vector.broadcast %cst_10 : f32 to vector<8x1xf32>
    %21 = arith.addf %18, %20 : vector<8x1xf32>
    %cst_11 = arith.constant 1.000000e+00 : f32
    %22 = vector.broadcast %cst_11 : f32 to vector<8x1xf32>
    %23 = arith.divf %22, %21 : vector<8x1xf32>
    %24 = vector.broadcast %23 : vector<8x1xf32> to vector<8x640xf32>
    %25 = arith.mulf %0, %24 : vector<8x640xf32>
    %cst_12 = arith.constant dense<0.000000e+00> : vector<640xf32>
    %26 = vector.multi_reduction <add>, %25, %cst_12 [0] : vector<8x640xf32> to vector<640xf32>
    %27 = vector.shape_cast %26 : vector<640xf32> to vector<1x640xf32>
    %c0_13 = arith.constant 0 : index
    %c0_14 = arith.constant 0 : index
    %28 = vector.load %arg2[%c0_13, %c0_14] : memref<1x640xf32, #tpu.memory_space<vmem>>, vector<1x640xf32>
    tpu.vector_store %arg2[%c0_13, %c0_14], %27 {strides = array<i32>} : memref<1x640xf32, #tpu.memory_space<vmem>>, vector<1x640xf32>,
    return
  }
}

</mosaic_0001>

<bundles_post_ra>
// kernel: tpu_custom_call.1
= control target key start
LH: loop header
LB: loop body
LE: loop exit
PB: predicated region body
PF: predicated region fallthrough
CT: control target
= control target key end

     0   :  { %9 = vsyncpa [#allocation3], 0  ;;  %s292_s0 = inlined_call_operand.hbm [shape: f32[8,640], index: 0, kind: input, shape index: {}]   ;;  %s293_s1 = inlined_call_operand.vmem [shape: f32[8,1], index: 1, kind: input, shape index: {}]   ;;  %s294_s2 = inlined_call_operand.hbm [shape: f32[1,640], index: 2, kind: output, shape index: {0}]   ;;  %s295_s3 = inlined_call_operand.vmem [shape: f32[8,1], index: 3, kind: output, shape index: {1}]  }
   0x1   :  { %10 = vsyncpa [#allocation4], 0  ;;  %s238_s12 = smov [#allocation2]   ;;  %s190_s16 = scalar_lea.hbm %s292_s0, 640 }
   0x2   :  { %s17_s13 = sshll.u32 %s238_s12, 4  ;;  %p191_p0 = scmp.ne.s32.totalorder %s292_s0, %s190_s16  ;;  %s18_s13 = int_to_ptr.vmem [resolvable:$true] %s17_s13 }
   0x3   :  { %p194_p1 = scmp.lt.u32.totalorder %s190_s16, %s292_s0 }
   0x5   :  { %p196_p2 = pnand %p194_p1, %p191_p0 }
   0x7   :  { %199 = shalt.err (!%p196_p2)
}
   0x8   :  { %s200_s21 = scalar_lea.vmem %s18_s13, 640  ;;  %p205_p4 = scmp.lt.s32.totalorder %s18_s13, %s18_s13 }
   0x9   :  { %p201_p3 = scmp.ne.s32.totalorder %s18_s13, %s200_s21  ;;  %p206_p5 = scmp.lt.s32.totalorder %s200_s21, %s200_s21 }
   0xb   :  { %p207_p6 = por %p206_p5, %p205_p4 }
   0xd   :  { %p208_p7 = pnand %p207_p6, %p201_p3 }
   0xf   :  { %211 = shalt.err (!%p208_p7)
}
  0x10   :  { %20 = dma.hbm_to_vmem [thread:$0]  %s292_s0, 640, %s18_s13, [#allocation3]  }
  0x11   :  { %234 = dma.done.wait [#allocation3], 640  }
  0x12   :  { %235 = vsyncadd [#allocation3], 4294966656  ;;  %v26_v0 = vld [vmem:[#allocation2] sm:$0xff]  ;;  %v27_v1 = vld [vmem:[#allocation2 + $0x8] sm:$0xff]  ;;  %v239_v25 = vmov 0   ;;  %vm66_vm2 = vcmask 7168   ;;  %v121_v52 = vlaneseq }
  0x13   :  { %v28_v2 = vld [vmem:[#allocation2 + $0x10] sm:$0xff]  ;;  %v31_v3 = vadd.f32 %v27_v1, %v26_v0  ;;  %v29_v4 = vld [vmem:[#allocation2 + $0x18] sm:$0xff]  ;;  %v30_v6 = vld [vmem:[#allocation2 + $0x20] sm:$0xff]  ;;  %184 = vset.pattern.permute.xlu1 %v239_v25  ;;  %185 = vset.pattern.permute.xlu0 %v239_v25  ;;  %v240_v50 = vmov 1966171168  }
  0x14   :  { %v62_v29 = vld [vmem:[%s293_s1] sm:$0xff]  ;;  %v119_v51 = vunpack.c.l.s4 %v240_v50  ;;  %s241_s1 = smov [#allocation5]   ;;  %vm158_vm3 = vcmp.lt.s32.totalorder %v121_v52, 640 }
  0x15   :  { %v32_v5 = vadd.f32 %v31_v3, %v28_v2  ;;  %v63_v33 = vmul.f32 0.9, %v62_v29 }
  0x16   :  { %v120_v63 = vunpack.c.0.s8 %v119_v51 }
  0x17   :  { %v33_v7 = vadd.f32 %v32_v5, %v29_v4 }
  0x19   :  { %v34_v8 = vadd.f32 %v33_v7, %v30_v6 }
  0x1b   :  { %35 = vadd.xlane.f32.xlu0 %v34_v8 }
  0xa8   :  { %v36_v9 = vpop.xlane.xlu0 %35 }
  0xa9   :  { %v37_v10 = vmul.f32 0.0015625, %v36_v9 }
  0xab   :  { %v38_v11 = vsub.f32 %v26_v0, %v37_v10  ;;  %v39_v12 = vsub.f32 %v27_v1, %v37_v10  ;;  %v40_v13 = vsub.f32 %v28_v2, %v37_v10  ;;  %v41_v14 = vsub.f32 %v29_v4, %v37_v10 }
  0xac   :  { %v42_v17 = vsub.f32 %v30_v6, %v37_v10 }
  0xad   :  { %v43_v15 = vmul.f32 %v38_v11, %v38_v11  ;;  %v44_v16 = vmul.f32 %v39_v12, %v39_v12  ;;  %v45_v18 = vmul.f32 %v40_v13, %v40_v13  ;;  %v46_v20 = vmul.f32 %v41_v14, %v41_v14 }
  0xae   :  { %v47_v22 = vmul.f32 %v42_v17, %v42_v17 }
  0xaf   :  { %v48_v19 = vadd.f32 %v44_v16, %v43_v15 }
  0xb1   :  { %v49_v21 = vadd.f32 %v48_v19, %v45_v18 }
  0xb3   :  { %v50_v23 = vadd.f32 %v49_v21, %v46_v20 }
  0xb5   :  { %v51_v24 = vadd.f32 %v50_v23, %v47_v22 }
  0xb7   :  { %52 = vadd.xlane.f32.xlu0 %v51_v24 }
 0x144   :  { %v53_v26 = vpop.xlane.xlu0 %52 }
 0x145   :  { %v54_v27 = vmul.f32 0.0015649452, %v53_v26 }
 0x147   :  { %186 = vrsqrt.f32 %v54_v27  ;;  %vm57_vm0 = vcmp.eq.f32.partialorder %v54_v27, inf  ;;  %v60_v31 = vand.u32 2147483648, %v54_v27  ;;  %vm59_vm1 = vcmp.eq.f32.partialorder %v54_v27, 0.0 }
 0x151   :  { %v187_v28 = vpop.eup %186 }
 0x152   :  { %v56_v30 = vmul.f32 %v187_v28, %v54_v27 }
 0x154   :  { %v58_v32 = vsel %vm57_vm0, %v54_v27, %v56_v30 }
 0x155   :  { %v61_v34 = vsel %vm59_vm1, %v60_v31, %v58_v32 }
 0x156   :  { %v64_v35 = vmul.f32 0.1, %v61_v34 }
 0x158   :  { %v65_v36 = vadd.f32 %v64_v35, %v63_v33 }
 0x15a   :  { %v68_v37 = vadd.f32 1e-08, %v65_v36  ;;  %67 = vst.msk [vmem:[%s295_s3] sm:$0xff] %vm66_vm2, %v65_v36  ;;  %s167_s3 = sshll.u32 %s241_s1, 4  ;;  %s168_s3 = int_to_ptr.vmem [resolvable:$true] %s167_s3 }
 0x15b   :  { %s212_s27 = scalar_lea.vmem %s168_s3, 80  ;;  %s216_s28 = scalar_lea.vmem %s168_s3, 96 }
 0x15c   :  { %188 = vrcp.f32 %v68_v37  ;;  %p213_p8 = scmp.ne.s32.totalorder %s168_s3, %s212_s27  ;;  %p217_p9 = scmp.lt.s32.totalorder %s168_s3, %s168_s3 }
 0x15d   :  { %p218_p10 = scmp.lt.s32.totalorder %s216_s28, %s212_s27 }
 0x15f   :  { %p219_p11 = por %p218_p10, %p217_p9 }
 0x161   :  { %p220_p12 = pnand %p219_p11, %p213_p8 }
 0x166   :  { %v189_v38 = vpop.eup %188 }
 0x167   :  { %73 = vperm.xlu1 %184, %v189_v38  }
 0x1e6   :  { %v74_v39 = vpop.permute.xlu1 %73 }
 0x1e7   :  { %v76_v40 = vmul.f32 %v74_v39, %v26_v0  ;;  %v77_v41 = vmul.f32 %v74_v39, %v27_v1  ;;  %v78_v42 = vmul.f32 %v74_v39, %v28_v2  ;;  %v79_v43 = vmul.f32 %v74_v39, %v29_v4 }
 0x1e8   :  { %v80_v44 = vmul.f32 %v74_v39, %v30_v6  ;;  %v122_v0 = vshrl.u32 %v121_v52, 7 }
 0x1e9   :  { %v81_v45 = vrot.slane %v76_v40, 4  ;;  %v87_v46 = vrot.slane %v77_v41, 4  ;;  %v93_v47 = vrot.slane %v78_v42, 4  ;;  %v99_v48 = vrot.slane %v79_v43, 4 }
 0x1ea   :  { %v105_v49 = vrot.slane %v80_v44, 4  ;;  %v123_v11 = vsub.s32 %v120_v63, %v122_v0 }
 0x1eb   :  { %v82_v53 = vadd.f32 %v81_v45, %v76_v40  ;;  %v88_v54 = vadd.f32 %v87_v46, %v77_v41  ;;  %v94_v55 = vadd.f32 %v93_v47, %v78_v42  ;;  %v100_v56 = vadd.f32 %v99_v48, %v79_v43 }
 0x1ec   :  { %v106_v57 = vadd.f32 %v105_v49, %v80_v44 }
 0x1ed   :  { %v83_v58 = vrot.slane %v82_v53, 2  ;;  %v89_v59 = vrot.slane %v88_v54, 2  ;;  %v95_v60 = vrot.slane %v94_v55, 2  ;;  %v101_v61 = vrot.slane %v100_v56, 2 }
 0x1ee   :  { %v107_v62 = vrot.slane %v106_v57, 2 }
 0x1ef   :  { %v84_v1 = vadd.f32 %v83_v58, %v82_v53  ;;  %v90_v2 = vadd.f32 %v89_v59, %v88_v54  ;;  %v96_v3 = vadd.f32 %v95_v60, %v94_v55  ;;  %v102_v4 = vadd.f32 %v101_v61, %v100_v56 }
 0x1f0   :  { %v108_v5 = vadd.f32 %v107_v62, %v106_v57 }
 0x1f1   :  { %v85_v6 = vrot.slane %v84_v1, 1  ;;  %v91_v7 = vrot.slane %v90_v2, 1  ;;  %v97_v8 = vrot.slane %v96_v3, 1  ;;  %v103_v9 = vrot.slane %v102_v4, 1 }
 0x1f2   :  { %v109_v10 = vrot.slane %v108_v5, 1 }
 0x1f3   :  { %v86_v12 = vadd.f32 %v85_v6, %v84_v1  ;;  %v92_v13 = vadd.f32 %v91_v7, %v90_v2  ;;  %v98_v14 = vadd.f32 %v97_v8, %v96_v3  ;;  %v104_v15 = vadd.f32 %v103_v9, %v102_v4 }
 0x1f4   :  { %v110_v16 = vadd.f32 %v109_v10, %v108_v5 }
 0x1f5   :  { %v116_v17 = vcombine.low %v86_v12, %v92_v13  ;;  %v117_v18 = vcombine.low %v98_v14, %v104_v15 }
 0x1f6   :  { %v138_v21 = vrot.slane %v110_v16, %v123_v11 }
 0x1f7   :  { %v124_v19 = vrot.slane %v116_v17, %v123_v11  ;;  %v131_v20 = vrot.slane %v117_v18, %v123_v11 }
 0x1f8   :  { %v153_v24 = vrot.slane %v138_v21, %v123_v11 }
 0x1f9   :  { %v139_v22 = vcombine.low %v124_v19, %v131_v20 }
 0x1fb   :  { %v146_v23 = vrot.slane %v139_v22, %v123_v11 }
 0x1fd   :  { %v154_v25 = vcombine.low %v146_v23, %v153_v24 }
 0x1ff   :  { %160 = vst.msk [vmem:[#allocation5] sm:$0x1f] %vm158_vm3, %v154_v25 }
 0x200   :  { %223 = shalt.err (!%p220_p12)
}
 0x201   :  { %s224_s4 = scalar_lea.hbm %s294_s2, 80 }
 0x202   :  { %p225_p13 = scmp.ne.s32.totalorder %s294_s2, %s224_s4  ;;  %p228_p0 = scmp.lt.u32.totalorder %s224_s4, %s294_s2 }
 0x204   :  { %p230_p1 = pnand %p228_p0, %p225_p13 }
 0x206   :  { %233 = shalt.err (!%p230_p1)
}
 0x207   :  { %170 = dma.vmem_to_hbm [thread:$0]  %s168_s3, 80, %s294_s2, [#allocation4]  }
 0x208   :  { %236 = dma.done.wait [#allocation4], 80  }
 0x209   :  { %237 = vsyncadd [#allocation4], 4294967216 }
 0x20a   :  { %178 = vsyncpa [#allocation3], 1 }
 0x20b   :  { %179 = vsyncpa [#allocation4], 1 }

</bundles_post_ra>
